<compile_context>
chip_gen: v7x
topology: tpu7x:2x2x1
jax: 0.10.0
libtpu: 0.0.40
codegen_flags: <defaults>
</compile_context>

<pallas_src>
import math
import functools

import jax
import jax.numpy as jnp
from jax.experimental import pallas as pl
from jax.experimental.pallas import tpu as pltpu


# ---------------------------------------------------------------------------
# Shared quantization math
# ---------------------------------------------------------------------------

def _quantize_int(w, e, b_param):
    """Integer-valued quantized weight round(clamp(2**(-e) * w, min, max)).

    `e`, `b_param` broadcast against `w` (per-output-channel parameters).
    Note: max(min(x, max_val), min_val) is equivalent to torch.clamp here because
    min_val = -2**(b-1) <= 2**(b-1) - 1 = max_val always, and both are 0 when
    b_rel == 0 (the degenerate zero-bit case).
    """
    b_rel = jnp.maximum(b_param, 0.0)
    zero = jnp.zeros_like(b_rel)
    min_val = jnp.where(b_rel > 0, -(2.0 ** (b_rel - 1.0)), zero)
    max_val = jnp.where(b_rel > 0, 2.0 ** (b_rel - 1.0) - 1.0, zero)
    scaled = (2.0 ** (-e)) * w
    return jnp.round(jnp.maximum(jnp.minimum(scaled, max_val), min_val))


# ---------------------------------------------------------------------------
# Kernels
# ---------------------------------------------------------------------------

def quantize_transpose_kernel(w_ref, e_ref, b_ref, o_ref):
    """Quantize + transpose one native weight tile (two-pass path, pass 1).

    w_ref : (tn, tk)  native (out, in) weight tile, f32
    e_ref : (1, tn)   per-output-channel exponent (lane-dense)
    b_ref : (1, tn)   per-output-channel bit-width (lane-dense)
    o_ref : (tk, tn)  integer-valued quantized weight, compute dtype, lane-dense in N
    """
    wt = jnp.transpose(w_ref[...])                    # (tk, tn); XLU hides under HBM-bound pass
    w_int = _quantize_int(wt, e_ref[...], b_ref[...])
    o_ref[...] = w_int.astype(o_ref.dtype)


def matmul_scale_bias_kernel(x_ref, w_ref, e_ref, bias_ref, o_ref):
    """One (m, n, k) grid step of y = (x @ w_int) * 2**e + bias (two-pass path, pass 2).

    x_ref   : (tm, tk)  activation tile (compute dtype)
    w_ref   : (tk, tn)  integer-valued quantized weight tile (compute dtype)
    e_ref   : (1, tn)   exponent (f32, lane-dense)
    bias_ref: (1, tn)   bias (f32, lane-dense)
    o_ref   : (tm, tn)  f32 output block; resident across k -> used as accumulator
    """
    k = pl.program_id(2)

    @pl.when(k == 0)
    def _init():
        o_ref[...] = jnp.zeros_like(o_ref)

    o_ref[...] += jnp.dot(x_ref[...], w_ref[...],
                          preferred_element_type=jnp.float32)

    @pl.when(k == pl.num_programs(2) - 1)
    def _finalize():
        o_ref[...] = o_ref[...] * (2.0 ** e_ref[...]) + bias_ref[...]


def fused_qmatmul_kernel(x_ref, w_ref, e_ref, b_ref, bias_ref, o_ref):
    """Small-M path: quantize the weight tile in-kernel, then matmul.

    x_ref   : (tm, tk)  activation tile (compute dtype)
    w_ref   : (tn, tk)  native f32 weight tile
    e_ref   : (1, tn)   exponent
    b_ref   : (1, tn)   bit-width
    bias_ref: (1, tn)   bias
    o_ref   : (tm, tn)  f32 output block; resident across k -> accumulator
    """
    k = pl.program_id(2)

    @pl.when(k == 0)
    def _init():
        o_ref[...] = jnp.zeros_like(o_ref)

    wt = jnp.transpose(w_ref[...])                    # (tk, tn)
    w_int = _quantize_int(wt, e_ref[...], b_ref[...]).astype(x_ref.dtype)
    o_ref[...] += jnp.dot(x_ref[...], w_int,
                          preferred_element_type=jnp.float32)

    @pl.when(k == pl.num_programs(2) - 1)
    def _finalize():
        o_ref[...] = o_ref[...] * (2.0 ** e_ref[...]) + bias_ref[...]


# ---------------------------------------------------------------------------
# Wrapper
# ---------------------------------------------------------------------------

def _round_up(x, m):
    return ((x + m - 1) // m) * m


def _pad_to(arr, shape):
    if tuple(arr.shape) == tuple(shape):
        return arr
    return jnp.zeros(shape, arr.dtype).at[
        tuple(slice(0, s) for s in arr.shape)].set(arr)


@functools.partial(jax.jit, static_argnames=("tm", "tn", "tk", "compute_dtype",
                                             "fuse_threshold", "vmem_limit_bytes"))
def qlinear(x, weight, e, b, bias=None, *,
            tm=512, tn=512, tk=1024,
            compute_dtype=jnp.bfloat16,
            fuse_threshold=2,
            vmem_limit_bytes=None):
    """QLinear forward.

    x      : (..., K) float32 activations
    weight : (N, K)   float32
    e, b   : (N, 1)   float32 per-output-channel exponent / bit-width
    bias   : (N,)     float32 or None
    Returns (..., N) float32.
    """
    orig_lead = x.shape[:-1]
    K = x.shape[-1]
    N = weight.shape[0]
    x2d = x.reshape(-1, K)
    M = x2d.shape[0]

    # --- tile selection (clipped to alignment-padded problem dims) ---
    tm_c = min(tm, _round_up(M, 8))
    Mp = _round_up(M, tm_c)
    m_tiles = Mp // tm_c
    # Small-M (decode) -> fuse quantization into the matmul; each weight tile is
    # consumed <= fuse_threshold times, so a separate w_int round trip only adds traffic.
    fused = m_tiles <= fuse_threshold

    tn_c = min(tn, _round_up(N, 128))
    if fused:
        # bound the in-kernel transpose/quantize VMEM footprint of the f32 weight tile
        tn_c = min(tn_c, 256)
    tk_c = min(tk, _round_up(K, 128))
    Np = _round_up(N, tn_c)
    Kp = _round_up(K, tk_c)
    # NOTE(v7x): with a single (m, n) tile the 2 TensorCores cannot both be fed;
    # that only happens for tiny layers where it is immaterial.

    # Zero-pad to tile multiples; padded K columns and padded N channels (e=0, b=0
    # -> w_int = 0, exp2(0)*0 + 0 = 0) contribute nothing and are sliced off.
    x_p = _pad_to(x2d, (Mp, Kp)).astype(compute_dtype)
    w_p = _pad_to(weight, (Np, Kp))                            # native (out, in) layout
    e_p = _pad_to(e.reshape(1, N).astype(jnp.float32), (1, Np))
    b_p = _pad_to(b.reshape(1, N).astype(jnp.float32), (1, Np))
    bias_vec = bias if bias is not None else jnp.zeros((N,), jnp.float32)
    bias_p = _pad_to(bias_vec.reshape(1, N).astype(jnp.float32), (1, Np))

    grid_mnk = (Mp // tm_c, Np // tn_c, Kp // tk_c)
    mm_cparams = pltpu.CompilerParams(
        dimension_semantics=("parallel", "parallel", "arbitrary"),
        vmem_limit_bytes=vmem_limit_bytes)

    if fused:
        out_p = pl.pallas_call(
            fused_qmatmul_kernel,
            out_shape=jax.ShapeDtypeStruct((Mp, Np), jnp.float32),
            grid_spec=pltpu.PrefetchScalarGridSpec(
                num_scalar_prefetch=0,
                grid=grid_mnk,
                in_specs=[
                    pl.BlockSpec((tm_c, tk_c), lambda i, j, k: (i, k)),   # x
                    pl.BlockSpec((tn_c, tk_c), lambda i, j, k: (j, k)),   # native weight
                    pl.BlockSpec((1, tn_c), lambda i, j, k: (0, j)),      # e
                    pl.BlockSpec((1, tn_c), lambda i, j, k: (0, j)),      # b
                    pl.BlockSpec((1, tn_c), lambda i, j, k: (0, j)),      # bias
                ],
                out_specs=pl.BlockSpec((tm_c, tn_c), lambda i, j, k: (i, j)),
            ),
            compiler_params=mm_cparams,
        )(x_p, w_p, e_p, b_p, bias_p)
    else:
        # --- pass 1: quantize (+ transpose from native layout) the weight once ---
        # Half-size tiles (when divisible) keep this HBM-bound pass comfortably inside
        # the default scoped VMEM; divisibility of Np/Kp is preserved by construction.
        tn1 = tn_c // 2 if tn_c % 256 == 0 else tn_c
        tk1 = tk_c // 2 if tk_c % 256 == 0 else tk_c
        w_int = pl.pallas_call(
            quantize_transpose_kernel,
            out_shape=jax.ShapeDtypeStruct((Kp, Np), compute_dtype),
            grid_spec=pltpu.PrefetchScalarGridSpec(
                num_scalar_prefetch=0,
                grid=(Np // tn1, Kp // tk1),
                in_specs=[
                    pl.BlockSpec((tn1, tk1), lambda i, j: (i, j)),        # native weight
                    pl.BlockSpec((1, tn1), lambda i, j: (0, i)),          # e
                    pl.BlockSpec((1, tn1), lambda i, j: (0, i)),          # b
                ],
                out_specs=pl.BlockSpec((tk1, tn1), lambda i, j: (j, i)),  # transposed out
            ),
            compiler_params=pltpu.CompilerParams(
                dimension_semantics=("parallel", "parallel"),
                vmem_limit_bytes=vmem_limit_bytes),
        )(w_p, e_p, b_p)

        # --- pass 2: tiled matmul, per-channel exp2(e) scale + bias in the finalize ---
        out_p = pl.pallas_call(
            matmul_scale_bias_kernel,
            out_shape=jax.ShapeDtypeStruct((Mp, Np), jnp.float32),
            grid_spec=pltpu.PrefetchScalarGridSpec(
                num_scalar_prefetch=0,
                grid=grid_mnk,
                in_specs=[
                    pl.BlockSpec((tm_c, tk_c), lambda i, j, k: (i, k)),   # activations
                    pl.BlockSpec((tk_c, tn_c), lambda i, j, k: (k, j)),   # w_int
                    pl.BlockSpec((1, tn_c), lambda i, j, k: (0, j)),      # e
                    pl.BlockSpec((1, tn_c), lambda i, j, k: (0, j)),      # bias
                ],
                out_specs=pl.BlockSpec((tm_c, tn_c), lambda i, j, k: (i, j)),
            ),
            compiler_params=mm_cparams,
        )(x_p, w_int, e_p, bias_p)

    out = out_p[:M, :N]
    return out.reshape(orig_lead + (N,))


# ---------------------------------------------------------------------------
# Pure-JAX reference
# ---------------------------------------------------------------------------

def qlinear_reference(x2d, weight, e, b, bias2d):
    b_rel = jnp.maximum(b, 0.0)
    zero = jnp.zeros_like(b_rel)
    min_val = jnp.where(b_rel > 0, -(2.0 ** (b_rel - 1.0)), zero)
    max_val = jnp.where(b_rel > 0, 2.0 ** (b_rel - 1.0) - 1.0, zero)
    scaled = (2.0 ** (-e)) * weight
    qw = jnp.maximum(jnp.minimum(scaled, max_val), min_val)
    w_eff = (2.0 ** e) * jnp.round(qw)
    y = jnp.dot(x2d, w_eff.T, precision=jax.lax.Precision.HIGHEST)
    return y + bias2d


# ---------------------------------------------------------------------------
# Test harness
# ---------------------------------------------------------------------------

if __name__ == "__main__":
    # small shapes implied by the module: batch=2, seq=8, in_features=32, out_features=64
    batch, seq, in_features, out_features = 2, 8, 32, 64

    key = jax.random.PRNGKey(0)
    k_x, k_w = jax.random.split(key)

    # deterministic parameter init mirroring QLinear.__init__
    scale = 1.0 / math.sqrt(in_features)
    weight = jax.random.uniform(
        k_w, (out_features, in_features), jnp.float32, minval=-scale, maxval=scale)
    bias = jnp.zeros((out_features,), jnp.float32)
    e = jnp.full((out_features, 1), -8.0, jnp.float32)
    b = jnp.full((out_features, 1), 32.0, jnp.float32)

    x = jax.random.normal(k_x, (batch, seq, in_features), jnp.float32)

    ref = qlinear_reference(
        x.reshape(-1, in_features), weight, e, b, bias.reshape(1, -1)
    ).reshape(batch, seq, out_features)

    # small-M fused path (default dispatch), exact f32 operands -> tight tolerance
    out_f32 = qlinear(x, weight, e, b, bias, compute_dtype=jnp.float32)
    jax.block_until_ready(out_f32)
    assert jnp.allclose(out_f32, ref, atol=1e-3, rtol=1e-3), "fused f32 path mismatch"

    # small-M fused path, bf16 operands (f32 accumulation, scale applied in f32)
    out_bf16 = qlinear(x, weight, e, b, bias, compute_dtype=jnp.bfloat16)
    jax.block_until_ready(out_bf16)
    assert jnp.allclose(out_bf16, ref, atol=5e-2, rtol=5e-2), "fused bf16 path mismatch"

    # two-pass path (quantize-once kernel + matmul kernel), forced via fuse_threshold=0
    out_2p = qlinear(x, weight, e, b, bias, compute_dtype=jnp.float32, fuse_threshold=0)
    jax.block_until_ready(out_2p)
    assert jnp.allclose(out_2p, ref, atol=1e-3, rtol=1e-3), "two-pass f32 path mismatch"

    out_2p_bf16 = qlinear(x, weight, e, b, bias, compute_dtype=jnp.bfloat16, fuse_threshold=0)
    jax.block_until_ready(out_2p_bf16)
    assert jnp.allclose(out_2p_bf16, ref, atol=5e-2, rtol=5e-2), "two-pass bf16 path mismatch"

    print("KERNEL_OK")
</pallas_src>

<mosaic_0001>
module attributes {stable_mosaic.version = 11 : i64} {
  func.func @fused_qmatmul_kernel(%arg0: i32, %arg1: i32, %arg2: i32, %arg3: memref<16x128xf32, #tpu.memory_space<vmem>>, %arg4: memref<128x128xf32, #tpu.memory_space<vmem>>, %arg5: memref<1x128xf32, #tpu.memory_space<vmem>>, %arg6: memref<1x128xf32, #tpu.memory_space<vmem>>, %arg7: memref<1x128xf32, #tpu.memory_space<vmem>>, %arg8: memref<16x128xf32, #tpu.memory_space<vmem>>) attributes {dimension_semantics = [#tpu.dimension_semantics<parallel>, #tpu.dimension_semantics<parallel>, #tpu.dimension_semantics<arbitrary>], iteration_bounds = array<i64: 1, 1, 1>, scalar_prefetch = 0 : i64, scratch_operands = 0 : i64, tpu.core_type = #tpu.core_type<tc>, window_params = [{transform_indices = @transform_0, window_bounds = array<i64: 16, 128>}, {transform_indices = @transform_1, window_bounds = array<i64: 128, 128>}, {transform_indices = @transform_2, window_bounds = array<i64: 1, 128>}, {transform_indices = @transform_3, window_bounds = array<i64: 1, 128>}, {transform_indices = @transform_4, window_bounds = array<i64: 1, 128>}, {transform_indices = @transform_5, window_bounds = array<i64: 16, 128>}]} {
    %c0_i32 = arith.constant 0 : i32
    %0 = arith.cmpi eq, %arg2, %c0_i32 : i32
    %1 = arith.extui %0 : i1 to i32
    %c0_i32_0 = arith.constant 0 : i32
    %2 = arith.cmpi ne, %1, %c0_i32_0 : i32
    scf.if %2 {
      %cst_23 = arith.constant 0.000000e+00 : f32
      %44 = vector.broadcast %cst_23 : f32 to vector<16x128xf32>
      %c0_24 = arith.constant 0 : index
      %c0_25 = arith.constant 0 : index
      %45 = vector.load %arg8[%c0_24, %c0_25] : memref<16x128xf32, #tpu.memory_space<vmem>>, vector<16x128xf32>
      tpu.vector_store %arg8[%c0_24, %c0_25], %44 {strides = array<i32>} : memref<16x128xf32, #tpu.memory_space<vmem>>, vector<16x128xf32>,
    } else {
    }
    %c0 = arith.constant 0 : index
    %c0_1 = arith.constant 0 : index
    %3 = vector.load %arg4[%c0, %c0_1] : memref<128x128xf32, #tpu.memory_space<vmem>>, vector<128x128xf32>
    %4 = tpu.transpose %3, [1, 0] : vector<128x128xf32> -> vector<128x128xf32>
    %c0_2 = arith.constant 0 : index
    %c0_3 = arith.constant 0 : index
    %5 = vector.load %arg5[%c0_2, %c0_3] : memref<1x128xf32, #tpu.memory_space<vmem>>, vector<1x128xf32>
    %c0_4 = arith.constant 0 : index
    %c0_5 = arith.constant 0 : index
    %6 = vector.load %arg6[%c0_4, %c0_5] : memref<1x128xf32, #tpu.memory_space<vmem>>, vector<1x128xf32>
    %cst = arith.constant 0.000000e+00 : f32
    %7 = vector.broadcast %cst : f32 to vector<1x128xf32>
    %8 = arith.maximumf %6, %7 : vector<1x128xf32>
    %cst_6 = arith.constant 0.000000e+00 : f32
    %9 = vector.broadcast %cst_6 : f32 to vector<1x128xf32>
    %cst_7 = arith.constant 0.000000e+00 : f32
    %10 = vector.broadcast %cst_7 : f32 to vector<1x128xf32>
    %11 = arith.cmpf ogt, %8, %10 : vector<1x128xf32>
    %cst_8 = arith.constant 1.000000e+00 : f32
    %12 = vector.broadcast %cst_8 : f32 to vector<1x128xf32>
    %13 = arith.subf %8, %12 : vector<1x128xf32>
    %14 = math.exp2 %13 : vector<1x128xf32>
    %cst_9 = arith.constant 0.000000e+00 : f32
    %15 = vector.broadcast %cst_9 : f32 to vector<1x128xf32>
    %16 = arith.subf %15, %14 : vector<1x128xf32>
    %17 = arith.select %11, %16, %9 : vector<1x128xi1>, vector<1x128xf32>
    %cst_10 = arith.constant 0.000000e+00 : f32
    %18 = vector.broadcast %cst_10 : f32 to vector<1x128xf32>
    %19 = arith.cmpf ogt, %8, %18 : vector<1x128xf32>
    %cst_11 = arith.constant 1.000000e+00 : f32
    %20 = vector.broadcast %cst_11 : f32 to vector<1x128xf32>
    %21 = arith.subf %8, %20 : vector<1x128xf32>
    %22 = math.exp2 %21 : vector<1x128xf32>
    %cst_12 = arith.constant 1.000000e+00 : f32
    %23 = vector.broadcast %cst_12 : f32 to vector<1x128xf32>
    %24 = arith.subf %22, %23 : vector<1x128xf32>
    %25 = arith.select %19, %24, %9 : vector<1x128xi1>, vector<1x128xf32>
    %cst_13 = arith.constant 0.000000e+00 : f32
    %26 = vector.broadcast %cst_13 : f32 to vector<1x128xf32>
    %27 = arith.subf %26, %5 : vector<1x128xf32>
    %28 = math.exp2 %27 : vector<1x128xf32>
    %29 = vector.broadcast %28 : vector<1x128xf32> to vector<128x128xf32>
    %30 = arith.mulf %29, %4 : vector<128x128xf32>
    %31 = vector.broadcast %25 : vector<1x128xf32> to vector<128x128xf32>
    %32 = arith.minimumf %30, %31 : vector<128x128xf32>
    %33 = vector.broadcast %17 : vector<1x128xf32> to vector<128x128xf32>
    %34 = arith.maximumf %32, %33 : vector<128x128xf32>
    %35 = math.roundeven %34 : vector<128x128xf32>
    %c0_14 = arith.constant 0 : index
    %c0_15 = arith.constant 0 : index
    %36 = vector.load %arg8[%c0_14, %c0_15] : memref<16x128xf32, #tpu.memory_space<vmem>>, vector<16x128xf32>
    %c0_16 = arith.constant 0 : index
    %c0_17 = arith.constant 0 : index
    %37 = vector.load %arg3[%c0_16, %c0_17] : memref<16x128xf32, #tpu.memory_space<vmem>>, vector<16x128xf32>
    %cst_18 = arith.constant dense<0.000000e+00> : vector<16x128xf32>
    %38 = tpu.matmul %37, %35, %cst_18 {dimension_numbers = #tpu.dot_dimension_numbers<[1], [0], [0], [1], [0, 0, 1, 1], [], []>} : vector<16x128xf32>, vector<128x128xf32>, vector<16x128xf32> -> vector<16x128xf32>
    %39 = arith.addf %36, %38 : vector<16x128xf32>
    %c0_19 = arith.constant 0 : index
    %c0_20 = arith.constant 0 : index
    %40 = vector.load %arg8[%c0_19, %c0_20] : memref<16x128xf32, #tpu.memory_space<vmem>>, vector<16x128xf32>
    tpu.vector_store %arg8[%c0_19, %c0_20], %39 {strides = array<i32>} : memref<16x128xf32, #tpu.memory_space<vmem>>, vector<16x128xf32>,
    %c0_i32_21 = arith.constant 0 : i32
    %41 = arith.cmpi eq, %arg2, %c0_i32_21 : i32
    %42 = arith.extui %41 : i1 to i32
    %c0_i32_22 = arith.constant 0 : i32
    %43 = arith.cmpi ne, %42, %c0_i32_22 : i32
    scf.if %43 {
      %c0_23 = arith.constant 0 : index
      %c0_24 = arith.constant 0 : index
      %44 = vector.load %arg8[%c0_23, %c0_24] : memref<16x128xf32, #tpu.memory_space<vmem>>, vector<16x128xf32>
      %c0_25 = arith.constant 0 : index
      %c0_26 = arith.constant 0 : index
      %45 = vector.load %arg5[%c0_25, %c0_26] : memref<1x128xf32, #tpu.memory_space<vmem>>, vector<1x128xf32>
      %46 = math.exp2 %45 : vector<1x128xf32>
      %47 = vector.broadcast %46 : vector<1x128xf32> to vector<16x128xf32>
      %48 = arith.mulf %44, %47 : vector<16x128xf32>
      %c0_27 = arith.constant 0 : index
      %c0_28 = arith.constant 0 : index
      %49 = vector.load %arg7[%c0_27, %c0_28] : memref<1x128xf32, #tpu.memory_space<vmem>>, vector<1x128xf32>
      %50 = vector.broadcast %49 : vector<1x128xf32> to vector<16x128xf32>
      %51 = arith.addf %48, %50 : vector<16x128xf32>
      %c0_29 = arith.constant 0 : index
      %c0_30 = arith.constant 0 : index
      %52 = vector.load %arg8[%c0_29, %c0_30] : memref<16x128xf32, #tpu.memory_space<vmem>>, vector<16x128xf32>
      tpu.vector_store %arg8[%c0_29, %c0_30], %51 {strides = array<i32>} : memref<16x128xf32, #tpu.memory_space<vmem>>, vector<16x128xf32>,
    } else {
    }
    return
  }
  func.func @transform_0(%arg0: i32, %arg1: i32, %arg2: i32) -> (i32, i32) {
    %c0_i32 = arith.constant 0 : i32
    return %arg0, %arg2 : i32, i32
  }
  func.func @transform_1(%arg0: i32, %arg1: i32, %arg2: i32) -> (i32, i32) {
    %c0_i32 = arith.constant 0 : i32
    return %arg1, %arg2 : i32, i32
  }
  func.func @transform_2(%arg0: i32, %arg1: i32, %arg2: i32) -> (i32, i32) {
    %c0_i32 = arith.constant 0 : i32
    %c0_i32_0 = arith.constant 0 : i32
    return %c0_i32, %arg1 : i32, i32
  }
  func.func @transform_3(%arg0: i32, %arg1: i32, %arg2: i32) -> (i32, i32) {
    %c0_i32 = arith.constant 0 : i32
    %c0_i32_0 = arith.constant 0 : i32
    return %c0_i32, %arg1 : i32, i32
  }
  func.func @transform_4(%arg0: i32, %arg1: i32, %arg2: i32) -> (i32, i32) {
    %c0_i32 = arith.constant 0 : i32
    %c0_i32_0 = arith.constant 0 : i32
    return %c0_i32, %arg1 : i32, i32
  }
  func.func @transform_5(%arg0: i32, %arg1: i32, %arg2: i32) -> (i32, i32) {
    %c0_i32 = arith.constant 0 : i32
    return %arg0, %arg1 : i32, i32
  }
}

</mosaic_0001>

<bundles_post_ra>
// kernel: qlinear.1
= control target key start
LH: loop header
LB: loop body
LE: loop exit
PB: predicated region body
PF: predicated region fallthrough
CT: control target
= control target key end

     0   :  { %v87_v22 = vlaneseq  ;;  %s554_s1 = inlined_call_operand.vmem [shape: f32[128,128], index: 1, kind: input, shape index: {}]   ;;  %s555_s0 = inlined_call_operand.vmem [shape: f32[16,128], index: 0, kind: input, shape index: {}]   ;;  %s556_s3 = inlined_call_operand.vmem [shape: f32[1,128], index: 3, kind: input, shape index: {}]   ;;  %s557_s2 = inlined_call_operand.vmem [shape: f32[1,128], index: 2, kind: input, shape index: {}]   ;;  %s558_s4 = inlined_call_operand.vmem [shape: f32[1,128], index: 4, kind: input, shape index: {}]   ;;  %s559_s5 = inlined_call_operand.vmem [shape: f32[16,128], index: 5, kind: output, shape index: {}]  }
   0x1   :  { %v26_v0 = vld [vmem:[%s554_s1] sm:$0xff]  ;;  %v27_v1 = vld [vmem:[%s554_s1 + $0x8] sm:$0xff]  ;;  %v28_v2 = vld [vmem:[%s554_s1 + $0x10] sm:$0xff] }
   0x2   :  { %42 = vxpose.xlu0.b32.start [1/16] %v26_v0, 128  ;;  %v29_v3 = vld [vmem:[%s554_s1 + $0x18] sm:$0xff]  ;;  %v30_v4 = vld [vmem:[%s554_s1 + $0x20] sm:$0xff]  ;;  %v31_v5 = vld [vmem:[%s554_s1 + $0x28] sm:$0xff]  ;;  %v88_v24 = vshrl.u32 %v87_v22, 7 }
   0x3   :  { %v32_v6 = vld [vmem:[%s554_s1 + $0x30] sm:$0xff]  ;;  %v33_v7 = vld [vmem:[%s554_s1 + $0x38] sm:$0xff]  ;;  %v34_v8 = vld [vmem:[%s554_s1 + $0x40] sm:$0xff] }
   0x4   :  { %v35_v9 = vld [vmem:[%s554_s1 + $0x48] sm:$0xff]  ;;  %v36_v10 = vld [vmem:[%s554_s1 + $0x50] sm:$0xff]  ;;  %v37_v11 = vld [vmem:[%s554_s1 + $0x58] sm:$0xff]  ;;  %v479_v26 = vsub.s32 0, %v88_v24 }
   0x5   :  { %v38_v12 = vld [vmem:[%s554_s1 + $0x60] sm:$0xff]  ;;  %v39_v13 = vld [vmem:[%s554_s1 + $0x68] sm:$0xff]  ;;  %v40_v14 = vld [vmem:[%s554_s1 + $0x70] sm:$0xff] }
   0x6   :  { %43 = vxpose.xlu0.b32.cont [2/16] %v27_v1, 128  ;;  %v41_v15 = vld [vmem:[%s554_s1 + $0x78] sm:$0xff]  ;;  %v170_v16 = vld [vmem:[%s555_s0] sm:$0xff] }
   0x7   :  { %334 = vmatprep.mubr.f32.mxu0 %v170_v16  ;;  %v75_v17 = vld [vmem:[%s556_s3] sm:$0x1] }
   0x8   :  { %v76_v18 = vmax.f32 %v75_v17, 0.0  ;;  %v74_v20 = vld [vmem:[%s557_s2] sm:$0x1] }
   0x9   :  { %v84_v21 = vsub.f32 0.0, %v74_v20 }
   0xa   :  { %44 = vxpose.xlu0.b32.cont [3/16] %v28_v2, 128  ;;  %v281_v19 = vadd.f32 -1.0, %v76_v18  ;;  %vm77_vm0 = vcmp.gt.f32.partialorder %v76_v18, 0.0 }
   0xc   :  { %386 = vpow2.f32 %v281_v19 }
   0xd   :  { %388 = vpow2.f32 %v84_v21 }
   0xe   :  { %45 = vxpose.xlu0.b32.cont [4/16] %v29_v3, 128 }
  0x12   :  { %46 = vxpose.xlu0.b32.cont [5/16] %v30_v4, 128 }
  0x16   :  { %47 = vxpose.xlu0.b32.cont [6/16] %v31_v5, 128  ;;  %v387_v23 = vpop.eup %386 }
  0x17   :  { %v282_v25 = vadd.f32 -1.0, %v387_v23  ;;  %v389_v27 = vpop.eup %388  ;;  %v80_v29 = vsub.f32 0.0, %v387_v23 }
  0x18   :  { %v482_v30 = vrot.slane %v389_v27, %v479_v26 }
  0x19   :  { %v83_v28 = vsel %vm77_vm0, %v282_v25, 0.0  ;;  %v81_v33 = vsel %vm77_vm0, %v80_v29, 0.0 }
  0x1a   :  { %48 = vxpose.xlu0.b32.cont [7/16] %v32_v6, 128  ;;  %v485_v31 = vrot.slane %v83_v28, %v479_v26  ;;  %v490_v36 = vrot.slane %v81_v33, %v479_v26 }
  0x1e   :  { %49 = vxpose.xlu0.b32.cont [8/16] %v33_v7, 128 }
  0x22   :  { %50 = vxpose.xlu0.b32.cont [9/16] %v34_v8, 128 }
  0x26   :  { %51 = vxpose.xlu0.b32.cont [10/16] %v35_v9, 128 }
  0x2a   :  { %52 = vxpose.xlu0.b32.cont [11/16] %v36_v10, 128 }
  0x2e   :  { %53 = vxpose.xlu0.b32.cont [12/16] %v37_v11, 128 }
  0x32   :  { %54 = vxpose.xlu0.b32.cont [13/16] %v38_v12, 128 }
  0x36   :  { %55 = vxpose.xlu0.b32.cont [14/16] %v39_v13, 128 }
  0x3a   :  { %56 = vxpose.xlu0.b32.cont [15/16] %v40_v14, 128 }
  0x3e   :  { %57 = vxpose.xlu0.b32.end [16/16] %v41_v15, 128 }
  0x82   :  { %v58_v32 = vpop.trf.xlu0 }
  0x83   :  { %v92_v34 = vmul.f32 %v482_v30, %v58_v32 }
  0x85   :  { %v114_v35 = vmin.f32 %v92_v34, %v485_v31 }
  0x86   :  { %v59_v37 = vpop.trf.xlu0 }
  0x87   :  { %v93_v38 = vmul.f32 %v482_v30, %v59_v37  ;;  %v136_v40 = vmax.f32 %v114_v35, %v490_v36 }
  0x89   :  { %v115_v39 = vmin.f32 %v93_v38, %v485_v31  ;;  %v369_v45 = vround.rtne.f32 %v136_v40 }
  0x8a   :  { %v60_v41 = vpop.trf.xlu0 }
  0x8b   :  { %v94_v42 = vmul.f32 %v482_v30, %v60_v41  ;;  %v137_v43 = vmax.f32 %v115_v39, %v490_v36 }
  0x8d   :  { %v116_v44 = vmin.f32 %v94_v42, %v485_v31  ;;  %v370_v46 = vround.rtne.f32 %v137_v43 }
  0x8e   :  { %v61_v47 = vpop.trf.xlu0 }
  0x8f   :  { %v95_v48 = vmul.f32 %v482_v30, %v61_v47  ;;  %v337_v49 = vpack.c.bf16 %v370_v46, %v369_v45  ;;  %v138_v50 = vmax.f32 %v116_v44, %v490_v36 }
  0x91   :  { %v117_v51 = vmin.f32 %v95_v48, %v485_v31  ;;  %338 = vmatprep.subr.bf16.mxu0 %v337_v49  ;;  %v371_v55 = vround.rtne.f32 %v138_v50 }
  0x92   :  { %v62_v52 = vpop.trf.xlu0  ;;  %340 = vmatpush3.bf16.msra.mxu0 %v337_v49 }
  0x93   :  { %v139_v53 = vmax.f32 %v117_v51, %v490_v36  ;;  %v96_v54 = vmul.f32 %v482_v30, %v62_v52 }
  0x95   :  { %v372_v56 = vround.rtne.f32 %v139_v53  ;;  %v118_v57 = vmin.f32 %v96_v54, %v485_v31 }
  0x96   :  { %v63_v58 = vpop.trf.xlu0 }
  0x97   :  { %v97_v59 = vmul.f32 %v482_v30, %v63_v58  ;;  %v341_v60 = vpack.c.bf16 %v372_v56, %v371_v55  ;;  %v140_v61 = vmax.f32 %v118_v57, %v490_v36 }
  0x99   :  { %v119_v62 = vmin.f32 %v97_v59, %v485_v31  ;;  %342 = vmatprep.subr.bf16.mxu0 %v341_v60  ;;  %v373_v2 = vround.rtne.f32 %v140_v61 }
  0x9a   :  { %v64_v63 = vpop.trf.xlu0  ;;  %344 = vmatpush3.bf16.msra.mxu0 %v341_v60 }
  0x9b   :  { %v141_v0 = vmax.f32 %v119_v62, %v490_v36  ;;  %v98_v1 = vmul.f32 %v482_v30, %v64_v63  ;;  %v171_v62 = vld [vmem:[%s555_s0 + $0x8] sm:$0xff] }
  0x9d   :  { %v374_v3 = vround.rtne.f32 %v141_v0  ;;  %v120_v4 = vmin.f32 %v98_v1, %v485_v31  ;;  %v283_v1 = vld [vmem:[%s558_s4] ss:$0 sm:$0xff] }
  0x9e   :  { %v65_v5 = vpop.trf.xlu0 }
  0x9f   :  { %v99_v6 = vmul.f32 %v482_v30, %v65_v5  ;;  %v345_v7 = vpack.c.bf16 %v374_v3, %v373_v2  ;;  %v142_v8 = vmax.f32 %v120_v4, %v490_v36 }
  0xa1   :  { %v121_v9 = vmin.f32 %v99_v6, %v485_v31  ;;  %346 = vmatprep.subr.bf16.mxu0 %v345_v7  ;;  %v375_v13 = vround.rtne.f32 %v142_v8 }
  0xa2   :  { %v66_v10 = vpop.trf.xlu0  ;;  %348 = vmatpush3.bf16.msra.mxu0 %v345_v7 }
  0xa3   :  { %v143_v11 = vmax.f32 %v121_v9, %v490_v36  ;;  %v100_v12 = vmul.f32 %v482_v30, %v66_v10 }
  0xa5   :  { %v376_v14 = vround.rtne.f32 %v143_v11  ;;  %v122_v15 = vmin.f32 %v100_v12, %v485_v31 }
  0xa6   :  { %v67_v16 = vpop.trf.xlu0 }
  0xa7   :  { %v101_v17 = vmul.f32 %v482_v30, %v67_v16  ;;  %v349_v18 = vpack.c.bf16 %v376_v14, %v375_v13  ;;  %v144_v19 = vmax.f32 %v122_v15, %v490_v36 }
  0xa9   :  { %v123_v20 = vmin.f32 %v101_v17, %v485_v31  ;;  %350 = vmatprep.subr.bf16.mxu0 %v349_v18  ;;  %v377_v24 = vround.rtne.f32 %v144_v19 }
  0xaa   :  { %v68_v21 = vpop.trf.xlu0  ;;  %352 = vmatpush3.bf16.msra.mxu0 %v349_v18 }
  0xab   :  { %v145_v22 = vmax.f32 %v123_v20, %v490_v36  ;;  %v102_v23 = vmul.f32 %v482_v30, %v68_v21 }
  0xad   :  { %v378_v25 = vround.rtne.f32 %v145_v22  ;;  %v124_v27 = vmin.f32 %v102_v23, %v485_v31 }
  0xae   :  { %v69_v28 = vpop.trf.xlu0 }
  0xaf   :  { %v103_v29 = vmul.f32 %v482_v30, %v69_v28  ;;  %v353_v32 = vpack.c.bf16 %v378_v25, %v377_v24  ;;  %v146_v33 = vmax.f32 %v124_v27, %v490_v36 }
  0xb1   :  { %v125_v34 = vmin.f32 %v103_v29, %v485_v31  ;;  %354 = vmatprep.subr.bf16.mxu0 %v353_v32  ;;  %v379_v39 = vround.rtne.f32 %v146_v33 }
  0xb2   :  { %v70_v35 = vpop.trf.xlu0  ;;  %356 = vmatpush3.bf16.msra.mxu0 %v353_v32 }
  0xb3   :  { %v147_v37 = vmax.f32 %v125_v34, %v490_v36  ;;  %v104_v38 = vmul.f32 %v482_v30, %v70_v35 }
  0xb5   :  { %v380_v40 = vround.rtne.f32 %v147_v37  ;;  %v126_v41 = vmin.f32 %v104_v38, %v485_v31 }
  0xb6   :  { %v71_v42 = vpop.trf.xlu0 }
  0xb7   :  { %v105_v43 = vmul.f32 %v482_v30, %v71_v42  ;;  %v357_v44 = vpack.c.bf16 %v380_v40, %v379_v39  ;;  %v148_v45 = vmax.f32 %v126_v41, %v490_v36 }
  0xb9   :  { %v127_v46 = vmin.f32 %v105_v43, %v485_v31  ;;  %358 = vmatprep.subr.bf16.mxu0 %v357_v44  ;;  %v381_v50 = vround.rtne.f32 %v148_v45 }
  0xba   :  { %v72_v47 = vpop.trf.xlu0  ;;  %360 = vmatpush3.bf16.msra.mxu0 %v357_v44 }
  0xbb   :  { %v149_v48 = vmax.f32 %v127_v46, %v490_v36  ;;  %v106_v49 = vmul.f32 %v482_v30, %v72_v47 }
  0xbd   :  { %v382_v51 = vround.rtne.f32 %v149_v48  ;;  %v128_v52 = vmin.f32 %v106_v49, %v485_v31 }
  0xbe   :  { %v73_v53 = vpop.trf.xlu0 }
  0xbf   :  { %v107_v54 = vmul.f32 %v482_v30, %v73_v53  ;;  %v361_v55 = vpack.c.bf16 %v382_v51, %v381_v50  ;;  %v150_v56 = vmax.f32 %v128_v52, %v490_v36  ;;  %v256_v30 = vld [vmem:[%s557_s2] sm:$0x1] }
  0xc0   :  { %390 = vpow2.f32 %v256_v30 }
  0xc1   :  { %v129_v57 = vmin.f32 %v107_v54, %v485_v31  ;;  %362 = vmatprep.subr.bf16.mxu0 %v361_v55  ;;  %v383_v59 = vround.rtne.f32 %v150_v56 }
  0xc2   :  { %364 = vmatpush3.bf16.msra.mxu0 %v361_v55 }
  0xc3   :  { %v151_v58 = vmax.f32 %v129_v57, %v490_v36 }
  0xc5   :  { %v384_v60 = vround.rtne.f32 %v151_v58 }
  0xc7   :  { %v365_v61 = vpack.c.bf16 %v384_v60, %v383_v59 }
  0xc9   :  { %366 = vmatprep.subr.bf16.mxu0 %v365_v61 }
  0xca   :  { %368 = vmatpush3.bf16.msra.mxu0 %v365_v61  ;;  %v391_v31 = vpop.eup %390 }
  0xcb   :  { %v262_v63 = vrot.slane %v391_v31, %v479_v26 }
  0xcd   :  { %335 = vmatmul.mubr.f32.vlgmr.msra.gmra.mrb[0].mxu0 %v171_v62 }
 0x1a0   :  { %v336_v0 = vpop.f32.mrb[0].mxu0 }
 0x1a1   :  { %v238_v36 = vpop.f32.mrb[1].mxu0  ;;  %v265_v2 = vmul.f32 %v336_v0, %v262_v63 }
 0x1a2   :  { %v264_v3 = vmul.f32 %v262_v63, %v238_v36 }
 0x1a3   :  { %v274_v4 = vadd.f32 %v283_v1, %v265_v2 }
 0x1a4   :  { %v273_v5 = vadd.f32 %v283_v1, %v264_v3 }
 0x1a5   :  { %276 = vst [vmem:[%s559_s5 + $0x8] sm:$0xff] %v274_v4 }
 0x1a6   :  { %275 = vst [vmem:[%s559_s5] sm:$0xff] %v273_v5 }

</bundles_post_ra>
